<compile_context>
chip_gen: v6e
topology: v6e:2x2x1
jax: 0.10.0
libtpu: 0.0.40
codegen_flags: <defaults>
</compile_context>

<pallas_src>
import jax
import jax.numpy as jnp
from jax.experimental import pallas as pl
from jax.experimental.pallas import tpu as pltpu


FACTOR_NUM = 32
IN0 = FACTOR_NUM           # 32   user embedding width
IN1 = FACTOR_NUM * 5       # 160  5 concatenated item embeddings
H1 = 256
H2 = 128
OUT_DIM = FACTOR_NUM       # 32
OUT_PAD = 128              # lane-dense padded output width
DROP_P = 0.5               # F.dropout(x, p=0.5) -> training=True by default
TB_MAX = 256               # batch tile: MXU-friendly M, tiny VMEM footprint


def _round_up(n, m):
    return ((n + m - 1) // m) * m


def _actor_mlp_kernel(x0_ref, x1_ref, m1_ref, m2_ref,
                      w1a_ref, w1b_ref, b1_ref,
                      w2_ref, b2_ref,
                      w3_ref, b3_ref,
                      o_ref):
    # fc1 -- split into user-part + item-part (avoids the HBM concat).
    # bf16 MXU inputs, f32 accumulate.
    h = (jnp.dot(x0_ref[...], w1a_ref[...], preferred_element_type=jnp.float32)
         + jnp.dot(x1_ref[...], w1b_ref[...], preferred_element_type=jnp.float32)
         + b1_ref[...])
    # dropout(p=0.5) then relu, fused: mask is pre-scaled to {0, 1/(1-p)} and
    # relu(dropout(h)) == max(h, 0) * mask since mask >= 0.
    h = jnp.maximum(h, 0.0) * m1_ref[...]

    # fc2
    h = (jnp.dot(h.astype(jnp.bfloat16), w2_ref[...],
                 preferred_element_type=jnp.float32) + b2_ref[...])
    h = jnp.maximum(h, 0.0) * m2_ref[...]

    # out (padded to 128 lanes for unmasked, lane-dense stores)
    act = (jnp.dot(h.astype(jnp.bfloat16), w3_ref[...],
                   preferred_element_type=jnp.float32) + b3_ref[...])
    o_ref[...] = act.astype(o_ref.dtype)


def actor_forward(x0_ids, x1_ids, params, dropout_key):
    """x0_ids: (B,) user ids; x1_ids: (B, 5) item ids."""
    # Embedding lookups (plain-JAX glue).
    # TODO(synk): fold the embedding gather into the kernel via scalar-prefetch
    # row DMA to avoid materializing the gathered activations in HBM.
    x0 = jnp.take(params["embed_user"], x0_ids.astype(jnp.int32), axis=0)
    x0 = x0.reshape(-1, IN0)
    x1 = jnp.take(params["embed_item"], x1_ids.astype(jnp.int32), axis=0)
    x1 = x1.reshape(-1, IN1)

    B = x0.shape[0]
    # Multiple of 16 keeps bf16 sublane packing happy; cap at TB_MAX per tile.
    TB = min(TB_MAX, _round_up(B, 16))
    B_pad = _round_up(B, TB)
    grid = (B_pad // TB,)
    pad = B_pad - B

    x0 = jnp.pad(x0, ((0, pad), (0, 0))).astype(jnp.bfloat16)
    x1 = jnp.pad(x1, ((0, pad), (0, 0))).astype(jnp.bfloat16)

    # Training-mode dropout masks, pre-scaled by 1/(1-p) -> values in {0, 2}.
    k1, k2 = jax.random.split(dropout_key)
    scale = 1.0 / (1.0 - DROP_P)
    m1 = jax.random.bernoulli(k1, 1.0 - DROP_P, (B_pad, H1)).astype(jnp.float32) * scale
    m2 = jax.random.bernoulli(k2, 1.0 - DROP_P, (B_pad, H2)).astype(jnp.float32) * scale

    # Weights: bf16 MXU inputs; fc1 split to match x0/x1; out padded to 128.
    w1 = params["w1"].astype(jnp.bfloat16)
    w1a, w1b = w1[:IN0], w1[IN0:]
    b1 = params["b1"]
    w2 = params["w2"].astype(jnp.bfloat16)
    b2 = params["b2"]
    w3 = jnp.pad(params["w3"], ((0, 0), (0, OUT_PAD - OUT_DIM))).astype(jnp.bfloat16)
    b3 = jnp.pad(params["b3"], ((0, 0), (0, OUT_PAD - OUT_DIM)))

    def batch_spec(cols):
        return pl.BlockSpec((TB, cols), lambda i: (i, 0))

    def resident_spec(rows, cols):
        # Full-array block, constant index -> DMA'd once, VMEM-resident.
        return pl.BlockSpec((rows, cols), lambda i: (0, 0))

    out = pl.pallas_call(
        _actor_mlp_kernel,
        out_shape=jax.ShapeDtypeStruct((B_pad, OUT_PAD), jnp.float32),
        grid=grid,
        in_specs=[
            batch_spec(IN0), batch_spec(IN1),        # x0, x1
            batch_spec(H1), batch_spec(H2),          # dropout masks
            resident_spec(IN0, H1), resident_spec(IN1, H1), resident_spec(1, H1),
            resident_spec(H1, H2), resident_spec(1, H2),
            resident_spec(H2, OUT_PAD), resident_spec(1, OUT_PAD),
        ],
        out_specs=batch_spec(OUT_PAD),
        compiler_params=pltpu.CompilerParams(
            dimension_semantics=("parallel",),
            vmem_limit_bytes=32 * 1024 * 1024,
        ),
    )(x0, x1, m1, m2, w1a, w1b, b1, w2, b2, w3, b3)

    return out[:B, :OUT_DIM]


def init_params(key, num_users=64, num_items=128):
    ks = jax.random.split(key, 8)

    # weight.data.normal_(0, 0.1) in the reference; biases small uniform.
    def nrm(k, shape):
        return (0.1 * jax.random.normal(k, shape)).astype(jnp.float32)

    def unif(k, shape, fan_in):
        bound = 1.0 / jnp.sqrt(fan_in)
        return jax.random.uniform(k, shape, minval=-bound, maxval=bound).astype(jnp.float32)

    in_dim = FACTOR_NUM * 6
    return {
        "embed_user": nrm(ks[0], (num_users, FACTOR_NUM)),
        "embed_item": nrm(ks[1], (num_items, FACTOR_NUM)),
        # stored as (in, out) = PyTorch weight.T
        "w1": nrm(ks[2], (in_dim, H1)),
        "b1": unif(ks[3], (1, H1), in_dim),
        "w2": nrm(ks[4], (H1, H2)),
        "b2": unif(ks[5], (1, H2), H1),
        "w3": nrm(ks[6], (H2, OUT_DIM)),
        "b3": unif(ks[7], (1, OUT_DIM), H2),
    }


if __name__ == "__main__":
    key = jax.random.PRNGKey(0)
    pkey, ikey0, ikey1, dkey = jax.random.split(key, 4)

    B = 8
    num_users, num_items = 64, 128
    params = init_params(pkey, num_users=num_users, num_items=num_items)

    x0_ids = jax.random.randint(ikey0, (B,), 0, num_users, dtype=jnp.int32)
    x1_ids = jax.random.randint(ikey1, (B, 5), 0, num_items, dtype=jnp.int32)

    action = actor_forward(x0_ids, x1_ids, params, dropout_key=dkey)
    action = jax.block_until_ready(action)

    assert action.shape == (B, FACTOR_NUM)
    assert action.dtype == jnp.float32
    assert bool(jnp.all(jnp.isfinite(action)))
    print("KERNEL_OK")
</pallas_src>

<mosaic_0001>
module attributes {stable_mosaic.version = 11 : i64} {
  func.func @_actor_mlp_kernel(%arg0: i32, %arg1: memref<16x32xbf16, #tpu.memory_space<vmem>>, %arg2: memref<16x160xbf16, #tpu.memory_space<vmem>>, %arg3: memref<16x256xf32, #tpu.memory_space<vmem>>, %arg4: memref<16x128xf32, #tpu.memory_space<vmem>>, %arg5: memref<32x256xbf16, #tpu.memory_space<vmem>>, %arg6: memref<160x256xbf16, #tpu.memory_space<vmem>>, %arg7: memref<1x256xf32, #tpu.memory_space<vmem>>, %arg8: memref<256x128xbf16, #tpu.memory_space<vmem>>, %arg9: memref<1x128xf32, #tpu.memory_space<vmem>>, %arg10: memref<128x128xbf16, #tpu.memory_space<vmem>>, %arg11: memref<1x128xf32, #tpu.memory_space<vmem>>, %arg12: memref<16x128xf32, #tpu.memory_space<vmem>>) attributes {dimension_semantics = [#tpu.dimension_semantics<parallel>], iteration_bounds = array<i64: 1>, scalar_prefetch = 0 : i64, scratch_operands = 0 : i64, tpu.core_type = #tpu.core_type<tc>, window_params = [{transform_indices = @transform_0, window_bounds = array<i64: 16, 32>}, {transform_indices = @transform_1, window_bounds = array<i64: 16, 160>}, {transform_indices = @transform_2, window_bounds = array<i64: 16, 256>}, {transform_indices = @transform_3, window_bounds = array<i64: 16, 128>}, {pipeline_mode = #tpu.pipeline_mode<synchronous>, transform_indices = @transform_4, window_bounds = array<i64: 32, 256>}, {pipeline_mode = #tpu.pipeline_mode<synchronous>, transform_indices = @transform_5, window_bounds = array<i64: 160, 256>}, {pipeline_mode = #tpu.pipeline_mode<synchronous>, transform_indices = @transform_6, window_bounds = array<i64: 1, 256>}, {pipeline_mode = #tpu.pipeline_mode<synchronous>, transform_indices = @transform_7, window_bounds = array<i64: 256, 128>}, {pipeline_mode = #tpu.pipeline_mode<synchronous>, transform_indices = @transform_8, window_bounds = array<i64: 1, 128>}, {pipeline_mode = #tpu.pipeline_mode<synchronous>, transform_indices = @transform_9, window_bounds = array<i64: 128, 128>}, {pipeline_mode = #tpu.pipeline_mode<synchronous>, transform_indices = @transform_10, window_bounds = array<i64: 1, 128>}, {transform_indices = @transform_11, window_bounds = array<i64: 16, 128>}]} {
    %c0 = arith.constant 0 : index
    %c0_0 = arith.constant 0 : index
    %0 = vector.load %arg1[%c0, %c0_0] : memref<16x32xbf16, #tpu.memory_space<vmem>>, vector<16x32xbf16>
    %c0_1 = arith.constant 0 : index
    %c0_2 = arith.constant 0 : index
    %1 = vector.load %arg5[%c0_1, %c0_2] : memref<32x256xbf16, #tpu.memory_space<vmem>>, vector<32x256xbf16>
    %cst = arith.constant dense<0.000000e+00> : vector<16x256xf32>
    %2 = tpu.matmul %0, %1, %cst {dimension_numbers = #tpu.dot_dimension_numbers<[1], [0], [0], [1], [0, 0, 1, 1], [], []>} : vector<16x32xbf16>, vector<32x256xbf16>, vector<16x256xf32> -> vector<16x256xf32>
    %c0_3 = arith.constant 0 : index
    %c0_4 = arith.constant 0 : index
    %3 = vector.load %arg2[%c0_3, %c0_4] : memref<16x160xbf16, #tpu.memory_space<vmem>>, vector<16x160xbf16>
    %c0_5 = arith.constant 0 : index
    %c0_6 = arith.constant 0 : index
    %4 = vector.load %arg6[%c0_5, %c0_6] : memref<160x256xbf16, #tpu.memory_space<vmem>>, vector<160x256xbf16>
    %cst_7 = arith.constant dense<0.000000e+00> : vector<16x256xf32>
    %5 = tpu.matmul %3, %4, %cst_7 {dimension_numbers = #tpu.dot_dimension_numbers<[1], [0], [0], [1], [0, 0, 1, 1], [], []>} : vector<16x160xbf16>, vector<160x256xbf16>, vector<16x256xf32> -> vector<16x256xf32>
    %6 = arith.addf %2, %5 : vector<16x256xf32>
    %c0_8 = arith.constant 0 : index
    %c0_9 = arith.constant 0 : index
    %7 = vector.load %arg7[%c0_8, %c0_9] : memref<1x256xf32, #tpu.memory_space<vmem>>, vector<1x256xf32>
    %8 = vector.broadcast %7 : vector<1x256xf32> to vector<16x256xf32>
    %9 = arith.addf %6, %8 : vector<16x256xf32>
    %cst_10 = arith.constant 0.000000e+00 : f32
    %10 = vector.broadcast %cst_10 : f32 to vector<16x256xf32>
    %11 = arith.maximumf %9, %10 : vector<16x256xf32>
    %c0_11 = arith.constant 0 : index
    %c0_12 = arith.constant 0 : index
    %12 = vector.load %arg3[%c0_11, %c0_12] : memref<16x256xf32, #tpu.memory_space<vmem>>, vector<16x256xf32>
    %13 = arith.mulf %11, %12 : vector<16x256xf32>
    %14 = arith.truncf %13 : vector<16x256xf32> to vector<16x256xbf16>
    %c0_13 = arith.constant 0 : index
    %c0_14 = arith.constant 0 : index
    %15 = vector.load %arg8[%c0_13, %c0_14] : memref<256x128xbf16, #tpu.memory_space<vmem>>, vector<256x128xbf16>
    %cst_15 = arith.constant dense<0.000000e+00> : vector<16x128xf32>
    %16 = tpu.matmul %14, %15, %cst_15 {dimension_numbers = #tpu.dot_dimension_numbers<[1], [0], [0], [1], [0, 0, 1, 1], [], []>} : vector<16x256xbf16>, vector<256x128xbf16>, vector<16x128xf32> -> vector<16x128xf32>
    %c0_16 = arith.constant 0 : index
    %c0_17 = arith.constant 0 : index
    %17 = vector.load %arg9[%c0_16, %c0_17] : memref<1x128xf32, #tpu.memory_space<vmem>>, vector<1x128xf32>
    %18 = vector.broadcast %17 : vector<1x128xf32> to vector<16x128xf32>
    %19 = arith.addf %16, %18 : vector<16x128xf32>
    %cst_18 = arith.constant 0.000000e+00 : f32
    %20 = vector.broadcast %cst_18 : f32 to vector<16x128xf32>
    %21 = arith.maximumf %19, %20 : vector<16x128xf32>
    %c0_19 = arith.constant 0 : index
    %c0_20 = arith.constant 0 : index
    %22 = vector.load %arg4[%c0_19, %c0_20] : memref<16x128xf32, #tpu.memory_space<vmem>>, vector<16x128xf32>
    %23 = arith.mulf %21, %22 : vector<16x128xf32>
    %24 = arith.truncf %23 : vector<16x128xf32> to vector<16x128xbf16>
    %c0_21 = arith.constant 0 : index
    %c0_22 = arith.constant 0 : index
    %25 = vector.load %arg10[%c0_21, %c0_22] : memref<128x128xbf16, #tpu.memory_space<vmem>>, vector<128x128xbf16>
    %cst_23 = arith.constant dense<0.000000e+00> : vector<16x128xf32>
    %26 = tpu.matmul %24, %25, %cst_23 {dimension_numbers = #tpu.dot_dimension_numbers<[1], [0], [0], [1], [0, 0, 1, 1], [], []>} : vector<16x128xbf16>, vector<128x128xbf16>, vector<16x128xf32> -> vector<16x128xf32>
    %c0_24 = arith.constant 0 : index
    %c0_25 = arith.constant 0 : index
    %27 = vector.load %arg11[%c0_24, %c0_25] : memref<1x128xf32, #tpu.memory_space<vmem>>, vector<1x128xf32>
    %28 = vector.broadcast %27 : vector<1x128xf32> to vector<16x128xf32>
    %29 = arith.addf %26, %28 : vector<16x128xf32>
    %c0_26 = arith.constant 0 : index
    %c0_27 = arith.constant 0 : index
    %30 = vector.load %arg12[%c0_26, %c0_27] : memref<16x128xf32, #tpu.memory_space<vmem>>, vector<16x128xf32>
    tpu.vector_store %arg12[%c0_26, %c0_27], %29 {strides = array<i32>} : memref<16x128xf32, #tpu.memory_space<vmem>>, vector<16x128xf32>,
    return
  }
  func.func @transform_0(%arg0: i32) -> (i32, i32) {
    %c0_i32 = arith.constant 0 : i32
    %c0_i32_0 = arith.constant 0 : i32
    return %arg0, %c0_i32 : i32, i32
  }
  func.func @transform_1(%arg0: i32) -> (i32, i32) {
    %c0_i32 = arith.constant 0 : i32
    %c0_i32_0 = arith.constant 0 : i32
    return %arg0, %c0_i32 : i32, i32
  }
  func.func @transform_2(%arg0: i32) -> (i32, i32) {
    %c0_i32 = arith.constant 0 : i32
    %c0_i32_0 = arith.constant 0 : i32
    return %arg0, %c0_i32 : i32, i32
  }
  func.func @transform_3(%arg0: i32) -> (i32, i32) {
    %c0_i32 = arith.constant 0 : i32
    %c0_i32_0 = arith.constant 0 : i32
    return %arg0, %c0_i32 : i32, i32
  }
  func.func @transform_4(%arg0: i32) -> (i32, i32) {
    %c0_i32 = arith.constant 0 : i32
    %c0_i32_0 = arith.constant 0 : i32
    %c0_i32_1 = arith.constant 0 : i32
    return %c0_i32, %c0_i32_0 : i32, i32
  }
  func.func @transform_5(%arg0: i32) -> (i32, i32) {
    %c0_i32 = arith.constant 0 : i32
    %c0_i32_0 = arith.constant 0 : i32
    %c0_i32_1 = arith.constant 0 : i32
    return %c0_i32, %c0_i32_0 : i32, i32
  }
  func.func @transform_6(%arg0: i32) -> (i32, i32) {
    %c0_i32 = arith.constant 0 : i32
    %c0_i32_0 = arith.constant 0 : i32
    %c0_i32_1 = arith.constant 0 : i32
    return %c0_i32, %c0_i32_0 : i32, i32
  }
  func.func @transform_7(%arg0: i32) -> (i32, i32) {
    %c0_i32 = arith.constant 0 : i32
    %c0_i32_0 = arith.constant 0 : i32
    %c0_i32_1 = arith.constant 0 : i32
    return %c0_i32, %c0_i32_0 : i32, i32
  }
  func.func @transform_8(%arg0: i32) -> (i32, i32) {
    %c0_i32 = arith.constant 0 : i32
    %c0_i32_0 = arith.constant 0 : i32
    %c0_i32_1 = arith.constant 0 : i32
    return %c0_i32, %c0_i32_0 : i32, i32
  }
  func.func @transform_9(%arg0: i32) -> (i32, i32) {
    %c0_i32 = arith.constant 0 : i32
    %c0_i32_0 = arith.constant 0 : i32
    %c0_i32_1 = arith.constant 0 : i32
    return %c0_i32, %c0_i32_0 : i32, i32
  }
  func.func @transform_10(%arg0: i32) -> (i32, i32) {
    %c0_i32 = arith.constant 0 : i32
    %c0_i32_0 = arith.constant 0 : i32
    %c0_i32_1 = arith.constant 0 : i32
    return %c0_i32, %c0_i32_0 : i32, i32
  }
  func.func @transform_11(%arg0: i32) -> (i32, i32) {
    %c0_i32 = arith.constant 0 : i32
    %c0_i32_0 = arith.constant 0 : i32
    return %arg0, %c0_i32 : i32, i32
  }
}

</mosaic_0001>

<bundles_post_ra>
// kernel: tpu_custom_call.1
= control target key start
LH: loop header
LB: loop body
LE: loop exit
PB: predicated region body
PF: predicated region fallthrough
CT: control target
= control target key end

     0   :  { %16 = vsyncpa [#allocation3], 0  ;;  %s1279_s0 = inlined_call_operand.hbm [shape: bf16[16,32], index: 0, kind: input, shape index: {}]   ;;  %s1280_s1 = inlined_call_operand.hbm [shape: bf16[16,160], index: 1, kind: input, shape index: {}]   ;;  %s1281_s2 = inlined_call_operand.hbm [shape: f32[16,256], index: 2, kind: input, shape index: {}]   ;;  %s1282_s3 = inlined_call_operand.hbm [shape: f32[16,128], index: 3, kind: input, shape index: {}]   ;;  %s1283_s4 = inlined_call_operand.hbm [shape: bf16[32,256], index: 4, kind: input, shape index: {}]   ;;  %s1284_s5 = inlined_call_operand.hbm [shape: bf16[160,256], index: 5, kind: input, shape index: {}]   ;;  %s1285_s6 = inlined_call_operand.vmem [shape: f32[1,256], index: 6, kind: input, shape index: {}]   ;;  %s1286_s7 = inlined_call_operand.hbm [shape: bf16[256,128], index: 7, kind: input, shape index: {}]   ;;  %s1287_s8 = inlined_call_operand.vmem [shape: f32[1,128], index: 8, kind: input, shape index: {}]   ;;  %s1288_s9 = inlined_call_operand.hbm [shape: bf16[128,128], index: 9, kind: input, shape index: {}]   ;;  %s1289_s10 = inlined_call_operand.vmem [shape: f32[1,128], index: 10, kind: input, shape index: {}]   ;;  %s1290_s11 = inlined_call_operand.hbm [shape: f32[16,128], index: 11, kind: output, shape index: {}]  }
   0x1   :  { %17 = vsyncpa [#allocation6], 0 }
   0x2   :  { %18 = vsyncpa [#allocation9], 0 }
   0x3   :  { %19 = vsyncpa [#allocation12], 0 }
   0x4   :  { %20 = vsyncpa [#allocation15], 0 }
   0x5   :  { %21 = vsyncpa [#allocation4], 0  ;;  %s1132_s17 = smov [#allocation5]  }
   0x6   :  { %s39_s18 = sshll.u32 %s1132_s17, 4  ;;  %s40_s18 = int_to_ptr.vmem [resolvable:$true] %s39_s18 }
   0x7   :  { %s948_s19 = scalar_lea.vmem %s40_s18, 256  ;;  %p953_p1 = scmp.lt.s32.totalorder %s40_s18, %s40_s18 }
   0x8   :  { %p949_p0 = scmp.ne.s32.totalorder %s40_s18, %s948_s19  ;;  %p954_p2 = scmp.lt.s32.totalorder %s948_s19, %s948_s19 }
   0xa   :  { %p955_p3 = por %p954_p2, %p953_p1 }
   0xc   :  { %p956_p4 = pnand %p955_p3, %p949_p0 }
   0xe   :  { %959 = shalt.err (!%p956_p4)
}
   0xf   :  { %s1133_s20 = smov 128   ;;  %s1134_s21 = smov 8  }
  0x10   :  { %45 = dma.hbm_to_vmem [thread:$0]  %s1280_s1, 256, %s40_s18, [#allocation6], %s1133_s20, %s1133_s20, %s1134_s21  }
  0x11   :  { %s1135_s24 = smov [#allocation8]   ;;  %s1136_s26 = smov [#allocation11]  }
  0x12   :  { %s63_s25 = sshll.u32 %s1135_s24, 4  ;;  %s87_s27 = sshll.u32 %s1136_s26, 4  ;;  %s64_s25 = int_to_ptr.vmem [resolvable:$true] %s63_s25  ;;  %s88_s27 = int_to_ptr.vmem [resolvable:$true] %s87_s27 }
  0x13   :  { %s968_s28 = scalar_lea.vmem %s64_s25, 256  ;;  %p973_p6 = scmp.lt.s32.totalorder %s64_s25, %s64_s25 }
  0x14   :  { %p969_p5 = scmp.ne.s32.totalorder %s64_s25, %s968_s28  ;;  %p974_p7 = scmp.lt.s32.totalorder %s968_s28, %s968_s28 }
  0x16   :  { %p975_p8 = por %p974_p7, %p973_p6 }
  0x18   :  { %p976_p9 = pnand %p975_p8, %p969_p5 }
  0x1a   :  { %979 = shalt.err (!%p976_p9)
}
  0x1b   :  { %69 = dma.hbm_to_vmem [thread:$0]  %s1282_s3, 256, %s64_s25, [#allocation9], %s1133_s20, %s1133_s20, %s1134_s21  }
  0x1c   :  { %s988_s1 = scalar_lea.vmem %s88_s27, 2560  ;;  %p993_p11 = scmp.lt.s32.totalorder %s88_s27, %s88_s27 }
  0x1d   :  { %p989_p10 = scmp.ne.s32.totalorder %s88_s27, %s988_s1  ;;  %p994_p12 = scmp.lt.s32.totalorder %s988_s1, %s988_s1 }
  0x1f   :  { %p995_p13 = por %p994_p12, %p993_p11 }
  0x21   :  { %p996_p0 = pnand %p995_p13, %p989_p10 }
  0x23   :  { %999 = shalt.err (!%p996_p0)
}
  0x24   :  { %93 = dma.hbm_to_vmem [thread:$0]  %s1284_s5, 2560, %s88_s27, [#allocation12], %s1133_s20, %s1133_s20, %s1134_s21  }
  0x25   :  { %s1137_s14 = smov [#allocation2]  }
  0x26   :  { %s27_s15 = sshll.u32 %s1137_s14, 4  ;;  %s28_s15 = int_to_ptr.vmem [resolvable:$true] %s27_s15 }
  0x27   :  { %s1008_s16 = scalar_lea.vmem %s28_s15, 128  ;;  %p1013_p2 = scmp.lt.s32.totalorder %s28_s15, %s28_s15 }
  0x28   :  { %p1009_p1 = scmp.ne.s32.totalorder %s28_s15, %s1008_s16  ;;  %p1014_p3 = scmp.lt.s32.totalorder %s1008_s16, %s1008_s16 }
  0x2a   :  { %p1015_p4 = por %p1014_p3, %p1013_p2 }
  0x2c   :  { %p1016_p5 = pnand %p1015_p4, %p1009_p1 }
  0x2e   :  { %1019 = shalt.err (!%p1016_p5)
}
  0x2f   :  { %s1138_s3 = smov 64   ;;  %s1139_s17 = smov 4  }
  0x30   :  { %33 = dma.hbm_to_vmem [thread:$0]  %s1279_s0, 128, %s28_s15, [#allocation3], %s1138_s3, %s1138_s3, %s1139_s17  }
  0x31   :  { %s1140_s5 = smov [#allocation7]  }
  0x32   :  { %s51_s22 = sshll.u32 %s1140_s5, 4  ;;  %s52_s22 = int_to_ptr.vmem [resolvable:$true] %s51_s22 }
  0x33   :  { %s1028_s23 = scalar_lea.vmem %s52_s22, 512  ;;  %p1033_p7 = scmp.lt.s32.totalorder %s52_s22, %s52_s22 }
  0x34   :  { %p1029_p6 = scmp.ne.s32.totalorder %s52_s22, %s1028_s23  ;;  %p1034_p8 = scmp.lt.s32.totalorder %s1028_s23, %s1028_s23 }
  0x36   :  { %p1035_p9 = por %p1034_p8, %p1033_p7 }
  0x38   :  { %p1036_p10 = pnand %p1035_p9, %p1029_p6 }
  0x3a   :  { %1039 = shalt.err (!%p1036_p10)
}
  0x3b   :  { %s1141_s24 = smov 256   ;;  %s1142_s25 = smov 16  }
  0x3c   :  { %57 = dma.hbm_to_vmem [thread:$0]  %s1281_s2, 512, %s52_s22, [#allocation6], %s1141_s24, %s1141_s24, %s1142_s25  }
  0x3d   :  { %s1143_s28 = smov [#allocation10]   ;;  %s1144_s0 = smov [#allocation13]  }
  0x3e   :  { %s75_s29 = sshll.u32 %s1143_s28, 4  ;;  %s101_s30 = sshll.u32 %s1144_s0, 4  ;;  %s76_s29 = int_to_ptr.vmem [resolvable:$true] %s75_s29  ;;  %s102_s30 = int_to_ptr.vmem [resolvable:$true] %s101_s30 }
  0x3f   :  { %s1048_s1 = scalar_lea.vmem %s76_s29, 512  ;;  %p1053_p12 = scmp.lt.s32.totalorder %s76_s29, %s76_s29 }
  0x40   :  { %p1049_p11 = scmp.ne.s32.totalorder %s76_s29, %s1048_s1  ;;  %p1054_p13 = scmp.lt.s32.totalorder %s1048_s1, %s1048_s1 }
  0x42   :  { %p1055_p0 = por %p1054_p13, %p1053_p12 }
  0x44   :  { %p1056_p1 = pnand %p1055_p0, %p1049_p11 }
  0x46   :  { %1059 = shalt.err (!%p1056_p1)
}
  0x47   :  { %81 = dma.hbm_to_vmem [thread:$0]  %s1283_s4, 512, %s76_s29, [#allocation9], %s1133_s20, %s1133_s20, %s1134_s21  }
  0x48   :  { %s1068_s2 = scalar_lea.vmem %s102_s30, 2048  ;;  %p1073_p3 = scmp.lt.s32.totalorder %s102_s30, %s102_s30 }
  0x49   :  { %p1069_p2 = scmp.ne.s32.totalorder %s102_s30, %s1068_s2  ;;  %p1074_p4 = scmp.lt.s32.totalorder %s1068_s2, %s1068_s2 }
  0x4b   :  { %p1075_p5 = por %p1074_p4, %p1073_p3 }
  0x4d   :  { %p1076_p6 = pnand %p1075_p5, %p1069_p2 }
  0x4f   :  { %1079 = shalt.err (!%p1076_p6)
}
  0x50   :  { %107 = dma.hbm_to_vmem [thread:$0]  %s1286_s7, 2048, %s102_s30, [#allocation12], %s1138_s3, %s1138_s3, %s1139_s17  }
  0x51   :  { %s1145_s16 = smov [#allocation14]  }
  0x52   :  { %s115_s18 = sshll.u32 %s1145_s16, 4  ;;  %s116_s18 = int_to_ptr.vmem [resolvable:$true] %s115_s18 }
  0x53   :  { %s1088_s19 = scalar_lea.vmem %s116_s18, 1024  ;;  %p1093_p8 = scmp.lt.s32.totalorder %s116_s18, %s116_s18 }
  0x54   :  { %p1089_p7 = scmp.ne.s32.totalorder %s116_s18, %s1088_s19  ;;  %p1094_p9 = scmp.lt.s32.totalorder %s1088_s19, %s1088_s19 }
  0x56   :  { %p1095_p10 = por %p1094_p9, %p1093_p8 }
  0x58   :  { %p1096_p11 = pnand %p1095_p10, %p1089_p7 }
  0x5a   :  { %1099 = shalt.err (!%p1096_p11)
}
  0x5b   :  { %121 = dma.hbm_to_vmem [thread:$0]  %s1288_s9, 1024, %s116_s18, [#allocation15], %s1138_s3, %s1138_s3, %s1139_s17  }
  0x5c   :  { %1120 = dma.done.wait [#allocation3], 128  }
  0x5d   :  { %1121 = vsyncadd [#allocation3], 4294967168 }
  0x5e   :  { %1122 = dma.done.wait [#allocation6], 768  }
  0x5f   :  { %1123 = vsyncadd [#allocation6], 4294966528 }
  0x60   :  { %1124 = dma.done.wait [#allocation9], 768  }
  0x61   :  { %1125 = vsyncadd [#allocation9], 4294966528 }
  0x62   :  { %1126 = dma.done.wait [#allocation12], 4608  }
  0x63   :  { %1127 = vsyncadd [#allocation12], 4294962688 }
  0x64   :  { %1128 = dma.done.wait [#allocation15], 1024  }
  0x65   :  { %1129 = vsyncadd [#allocation15], 4294966272  ;;  %v1146_v0 = vmov 0   ;;  %v876_v1 = vld [vmem:[#allocation11 + $0x74] ss:$8 sps:$4 sm:$0xff]   ;;  %vm286_vm0 = vcmask 261120   ;;  %v406_v49 = vlaneseq }
  0x66   :  { %393 = vmatprep.mubr.bf16.mxu1 %v1146_v0  ;;  %v878_v2 = vld [vmem:[#allocation11 + $0x70] ss:$8 sps:$4 sm:$0xff]   ;;  %290 = vmatprep.subr.bf16.mxu0 %v876_v1  ;;  %v879_v3 = vld [vmem:[#allocation11 + $0x64] ss:$8 sps:$4 sm:$0xff]   ;;  %v881_v4 = vld [vmem:[#allocation11 + $0x60] ss:$8 sps:$4 sm:$0xff]  }
  0x67   :  { %291 = vmatpush1.bf16.msra.mxu0 %v878_v2  ;;  %v882_v5 = vld [vmem:[#allocation11 + $0x54] ss:$8 sps:$4 sm:$0xff]   ;;  %v884_v6 = vld [vmem:[#allocation11 + $0x50] ss:$8 sps:$4 sm:$0xff]   ;;  %v885_v7 = vld [vmem:[#allocation11 + $0x44] ss:$8 sps:$4 sm:$0xff]  }
  0x68   :  { %292 = vmatprep.subr.bf16.mxu0 %v879_v3  ;;  %v897_v8 = vld [vmem:[#allocation10 + $0x14] ss:$8 sps:$4 sm:$0xff]   ;;  %v899_v9 = vld [vmem:[#allocation10 + $0x10] ss:$8 sps:$4 sm:$0xff]   ;;  %v887_v10 = vld [vmem:[#allocation11 + $0x40] ss:$8 sps:$4 sm:$0xff]  }
  0x69   :  { %v888_v11 = vld [vmem:[#allocation11 + $0x34] ss:$8 sps:$4 sm:$0xff]   ;;  %373 = vmatprep.subr.bf16.mxu1 %v897_v8  ;;  %v903_v12 = vld [vmem:[#allocation10 + $0x4] ss:$8 sps:$4 sm:$0xff]   ;;  %v905_v13 = vld [vmem:[#allocation10] ss:$8 sps:$4 sm:$0xff]  }
  0x6a   :  { %374 = vmatpush1.bf16.msra.mxu1 %v899_v9  ;;  %v890_v14 = vld [vmem:[#allocation11 + $0x30] ss:$8 sps:$4 sm:$0xff]   ;;  %v891_v15 = vld [vmem:[#allocation11 + $0x24] ss:$8 sps:$4 sm:$0xff]   ;;  %v893_v17 = vld [vmem:[#allocation11 + $0x20] ss:$8 sps:$4 sm:$0xff]  }
  0x6b   :  { %293 = vmatpush1.bf16.msra.mxu0 %v881_v4  ;;  %375 = vmatprep.subr.bf16.mxu1 %v903_v12  ;;  %v909_v16 = vld [vmem:[#allocation2] sm:$0xff]   ;;  %v915_v19 = vld [vmem:[#allocation5 + $0x4] ss:$8 sps:$4 sm:$0xff]   ;;  %v918_v23 = vld [vmem:[#allocation13 + $0x70] sm:$0xff]   ;;  %v1147_v45 = vmov 0.0   ;;  %v407_v51 = vshrl.u32 %v406_v49, 7 }
  0x6c   :  { %294 = vmatprep.subr.bf16.mxu0 %v882_v5  ;;  %v894_v18 = vld [vmem:[#allocation11 + $0x14] ss:$8 sps:$4 sm:$0xff]   ;;  %v896_v22 = vld [vmem:[#allocation11 + $0x10] ss:$8 sps:$4 sm:$0xff]   ;;  %774 = vmatprep.mubr.msk.bf16.mxu0 %vm286_vm0, %v915_v19  ;;  %v900_v24 = vld [vmem:[#allocation11 + $0x4] ss:$8 sps:$4 sm:$0xff]  }
  0x6d   :  { %v916_v20 = vld [vmem:[#allocation13 + $0x78] sm:$0xff]   ;;  %v919_v25 = vld [vmem:[#allocation13 + $0x30] sm:$0xff]   ;;  %v902_v26 = vld [vmem:[#allocation11] ss:$8 sps:$4 sm:$0xff]   ;;  %v412_v52 = vsub.s32 1, %v407_v51  ;;  %v408_v54 = vsub.s32 0, %v407_v51 }
  0x6e   :  { %376 = vmatpush1.bf16.msra.mxu1 %v905_v13  ;;  %v917_v21 = vld [vmem:[#allocation13 + $0x38] sm:$0xff]   ;;  %v910_v29 = vld [vmem:[#allocation11 + $0x84] ss:$8 sps:$4 sm:$0xff]   ;;  %v912_v30 = vld [vmem:[#allocation11 + $0x80] ss:$8 sps:$4 sm:$0xff]   ;;  %vm1148_vm1 = vmmov 0  }
  0x6f   :  { %295 = vmatpush1.bf16.msra.mxu0 %v884_v6  ;;  %807 = vmatprep.subr.bf16.mxu1 %v916_v20  ;;  %v906_v27 = vld [vmem:[#allocation11 + $0x94] ss:$8 sps:$4 sm:$0xff]   ;;  %v908_v28 = vld [vmem:[#allocation11 + $0x90] ss:$8 sps:$4 sm:$0xff]   ;;  %v913_v31 = vld [vmem:[#allocation5] ss:$8 sps:$4 sm:$0xff]  }
  0x70   :  { %296 = vmatprep.subr.bf16.mxu0 %v885_v7  ;;  %v920_v32 = vld [vmem:[#allocation13 + $0x68] sm:$0xff]   ;;  %v922_v34 = vld [vmem:[#allocation13 + $0x60] sm:$0xff]   ;;  %v924_v36 = vld [vmem:[#allocation13 + $0x58] sm:$0xff]  }
  0x71   :  { %780 = vmatmul.mubr.msk.bf16.vlgmr.msra.gmra.mxu1 %vm286_vm0, %v909_v16  ;;  %v921_v33 = vld [vmem:[#allocation13 + $0x28] sm:$0xff]   ;;  %v923_v35 = vld [vmem:[#allocation13 + $0x20] sm:$0xff]   ;;  %v925_v37 = vld [vmem:[#allocation13 + $0x18] sm:$0xff]  }
  0x72   :  { %808 = vmatpush3.bf16.msra.mxu1 %v917_v21  ;;  %v926_v38 = vld [vmem:[#allocation13 + $0x50] sm:$0xff]   ;;  %v928_v40 = vld [vmem:[#allocation13 + $0x48] sm:$0xff]   ;;  %v930_v42 = vld [vmem:[#allocation13 + $0x40] sm:$0xff]  }
  0x73   :  { %297 = vmatpush1.bf16.msra.mxu0 %v887_v10  ;;  %809 = vmatprep.subr.bf16.mxu1 %v918_v23  ;;  %v927_v39 = vld [vmem:[#allocation13 + $0x10] sm:$0xff]   ;;  %v929_v41 = vld [vmem:[#allocation13 + $0x8] sm:$0xff]   ;;  %v931_v43 = vld [vmem:[#allocation13] sm:$0xff]  }
  0x74   :  { %298 = vmatprep.subr.bf16.mxu0 %v888_v11  ;;  %v932_v44 = vld [vmem:[#allocation14 + $0x38] sm:$0xff]   ;;  %v933_v46 = vld [vmem:[#allocation14 + $0x30] sm:$0xff]   ;;  %v934_v47 = vld [vmem:[#allocation14 + $0x28] sm:$0xff]  }
  0x75   :  { %v935_v48 = vld [vmem:[#allocation14 + $0x20] sm:$0xff]   ;;  %v404_v55 = vld [vmem:[%s1285_s6] sm:$0x3]  ;;  %v427_v13 = vld [vmem:[#allocation7 + $0x18] sm:$0xff] }
  0x76   :  { %810 = vmatpush3.bf16.msra.mxu1 %v919_v25  ;;  %v413_v57 = vrot.slane %v404_v55, %v412_v52  ;;  %v409_v60 = vrot.slane %v404_v55, %v408_v54  ;;  %v426_v9 = vld [vmem:[#allocation7 + $0x10] sm:$0xff]  ;;  %v425_v12 = vld [vmem:[#allocation7 + $0x8] sm:$0xff]  ;;  %v937_v23 = vld [vmem:[#allocation14 + $0x10] sm:$0xff]  }
  0x77   :  { %299 = vmatpush1.bf16.msra.mxu0 %v890_v14  ;;  %811 = vmatprep.subr.bf16.mxu1 %v920_v32  ;;  %v424_v14 = vld [vmem:[#allocation7] sm:$0xff]  ;;  %v939_v25 = vld [vmem:[#allocation14] sm:$0xff]  }
  0x78   :  { %300 = vmatprep.subr.bf16.mxu0 %v891_v15 }
  0x7a   :  { %812 = vmatpush3.bf16.msra.mxu1 %v921_v33 }
  0x7b   :  { %301 = vmatpush1.bf16.msra.mxu0 %v893_v17  ;;  %813 = vmatprep.subr.bf16.mxu1 %v922_v34 }
  0x7c   :  { %302 = vmatprep.subr.bf16.mxu0 %v894_v18 }
  0x7e   :  { %814 = vmatpush3.bf16.msra.mxu1 %v923_v35 }
  0x7f   :  { %303 = vmatpush1.bf16.msra.mxu0 %v896_v22  ;;  %815 = vmatprep.subr.bf16.mxu1 %v924_v36  ;;  %v936_v22 = vld [vmem:[#allocation14 + $0x18] sm:$0xff]   ;;  %v612_v36 = vld [vmem:[#allocation8] sm:$0xff] }
  0x80   :  { %304 = vmatprep.subr.bf16.mxu0 %v900_v24  ;;  %v938_v24 = vld [vmem:[#allocation14 + $0x8] sm:$0xff]  }
  0x82   :  { %816 = vmatpush3.bf16.msra.mxu1 %v925_v37  ;;  %v613_v37 = vld [vmem:[#allocation8 + $0x8] sm:$0xff] }
  0x83   :  { %305 = vmatpush1.bf16.msra.mxu0 %v902_v26  ;;  %817 = vmatprep.subr.bf16.mxu1 %v926_v38 }
  0x84   :  { %318 = vmatprep.subr.bf16.mxu0 %v906_v27  ;;  %v781_v27 = vld [vmem:[%s1287_s8] ss:$0 sm:$0xff]  ;;  %s1149_s8 = smov [#allocation16]  }
  0x85   :  { %s736_s23 = sshll.u32 %s1149_s8, 4  ;;  %s737_s23 = int_to_ptr.vmem [resolvable:$true] %s736_s23 }
  0x86   :  { %818 = vmatpush3.bf16.msra.mxu1 %v927_v39  ;;  %s1100_s24 = scalar_lea.vmem %s737_s23, 256  ;;  %p1105_p13 = scmp.lt.s32.totalorder %s737_s23, %s737_s23 }
  0x87   :  { %319 = vmatpush2.bf16.msra.mxu0 %v908_v28  ;;  %819 = vmatprep.subr.bf16.mxu1 %v928_v40  ;;  %p1101_p12 = scmp.ne.s32.totalorder %s737_s23, %s1100_s24  ;;  %p1106_p0 = scmp.lt.s32.totalorder %s1100_s24, %s1100_s24 }
  0x88   :  { %320 = vmatprep.subr.bf16.mxu0 %v910_v29 }
  0x89   :  { %p1107_p1 = por %p1106_p0, %p1105_p13 }
  0x8a   :  { %820 = vmatpush3.bf16.msra.mxu1 %v929_v41 }
  0x8b   :  { %321 = vmatpush2.bf16.msra.mxu0 %v912_v30  ;;  %821 = vmatprep.subr.bf16.mxu1 %v930_v42  ;;  %v798_v42 = vld [vmem:[%s1289_s10] ss:$0 sm:$0xff]  ;;  %p1108_p2 = pnand %p1107_p1, %p1101_p12 }
  0x8c   :  { %838 = vmatprep.subr.bf16.mxu0 %v1147_v45 }
  0x8e   :  { %323 = vmatmul.mubr.bf16.vlgmr.msra.gmra.mxu0 %v913_v31  ;;  %822 = vmatpush3.bf16.msra.mxu1 %v931_v43 }
  0x8f   :  { %839 = vmatpush3.bf16.msra.mxu0 %v932_v44  ;;  %854 = vmatprep.mubr.msk.bf16.mxu0 %vm1148_vm1, %v1147_v45 }
  0x90   :  { %840 = vmatprep.subr.bf16.mxu0 %v1147_v45 }
  0x93   :  { %841 = vmatpush3.bf16.msra.mxu0 %v933_v46 }
  0x94   :  { %842 = vmatprep.subr.bf16.mxu0 %v1147_v45 }
  0x97   :  { %843 = vmatpush3.bf16.msra.mxu0 %v934_v47 }
  0x98   :  { %844 = vmatprep.subr.bf16.mxu0 %v1147_v45 }
  0x9b   :  { %845 = vmatpush3.bf16.msra.mxu0 %v935_v48 }
  0x9c   :  { %846 = vmatprep.subr.bf16.mxu0 %v1147_v45 }
  0x9f   :  { %847 = vmatpush3.bf16.msra.mxu0 %v936_v22 }
  0xa0   :  { %848 = vmatprep.subr.bf16.mxu0 %v1147_v45 }
  0xa3   :  { %849 = vmatpush3.bf16.msra.mxu0 %v937_v23 }
  0xa4   :  { %850 = vmatprep.subr.bf16.mxu0 %v1147_v45 }
  0xa7   :  { %851 = vmatpush3.bf16.msra.mxu0 %v938_v24 }
  0xa8   :  { %852 = vmatprep.subr.bf16.mxu0 %v1147_v45 }
  0xab   :  { %853 = vmatpush3.bf16.msra.mxu0 %v939_v25 }
 0x131   :  { %v395_v50 = vpop.f32.mrf.mxu1 }
 0x133   :  { %v397_v53 = vpop.f32.mrf.mxu1 }
 0x135   :  { %v399_v58 = vpop.f32.mrf.mxu1 }
 0x137   :  { %v401_v3 = vpop.f32.mrf.mxu1 }
 0x14e   :  { %v324_v56 = vpop.f32.mrf.mxu0 }
 0x14f   :  { %v396_v59 = vadd.f32 %v395_v50, %v324_v56 }
 0x150   :  { %v326_v61 = vpop.f32.mrf.mxu0 }
 0x151   :  { %v398_v62 = vadd.f32 %v397_v53, %v326_v61  ;;  %v416_v2 = vadd.f32 %v409_v60, %v396_v59 }
 0x152   :  { %v328_v63 = vpop.f32.mrf.mxu0 }
 0x153   :  { %v417_v0 = vadd.f32 %v413_v57, %v398_v62  ;;  %v400_v1 = vadd.f32 %v399_v58, %v328_v63  ;;  %v420_v11 = vmax.f32 %v416_v2, 0.0 }
 0x154   :  { %v330_v4 = vpop.f32.mrf.mxu0 }
 0x155   :  { %v418_v5 = vadd.f32 %v409_v60, %v400_v1  ;;  %v402_v6 = vadd.f32 %v401_v3, %v330_v4  ;;  %v421_v7 = vmax.f32 %v417_v0, 0.0  ;;  %v428_v19 = vmul.f32 %v424_v14, %v420_v11 }
 0x157   :  { %v422_v8 = vmax.f32 %v418_v5, 0.0  ;;  %v419_v10 = vadd.f32 %v413_v57, %v402_v6  ;;  %v429_v17 = vmul.f32 %v425_v12, %v421_v7 }
 0x159   :  { %v423_v15 = vmax.f32 %v419_v10, 0.0  ;;  %v430_v16 = vmul.f32 %v426_v9, %v422_v8 }
 0x15b   :  { %v431_v18 = vmul.f32 %v427_v13, %v423_v15  ;;  %v432_v21 = vpack.c.bf16 %v430_v16, %v428_v19 }
 0x15d   :  { %v433_v20 = vpack.c.bf16 %v431_v18, %v429_v17 }
 0x15f   :  { %601 = vmatprep.mubr.bf16.mxu1 %v433_v20 }
 0x160   :  { %602 = vmatmul.mubr.bf16.vlgmr.msra.gmra.mxu1 %v432_v21 }
 0x220   :  { %v823_v26 = vpop.f32.mrf.mxu1 }
 0x222   :  { %v824_v28 = vpop.f32.mrf.mxu1 }
 0x223   :  { %v825_v29 = vadd.f32 %v824_v28, %v823_v26 }
 0x224   :  { %v826_v30 = vpop.f32.mrf.mxu1 }
 0x225   :  { %v604_v31 = vadd.f32 %v825_v29, %v781_v27 }
 0x226   :  { %v827_v32 = vpop.f32.mrf.mxu1 }
 0x227   :  { %v828_v33 = vadd.f32 %v827_v32, %v826_v30  ;;  %v610_v34 = vmax.f32 %v604_v31, 0.0 }
 0x229   :  { %v607_v35 = vadd.f32 %v828_v33, %v781_v27  ;;  %v614_v39 = vmul.f32 %v612_v36, %v610_v34 }
 0x22b   :  { %v611_v38 = vmax.f32 %v607_v35, 0.0 }
 0x22d   :  { %v615_v40 = vmul.f32 %v613_v37, %v611_v38 }
 0x22f   :  { %v616_v41 = vpack.c.bf16 %v615_v40, %v614_v39 }
 0x231   :  { %855 = vmatmul.mubr.bf16.vlgmr.msra.gmra.mxu0 %v616_v41 }
 0x2f1   :  { %v722_v43 = vpop.f32.mrf.mxu0 }
 0x2f2   :  { %v723_v44 = vadd.f32 %v798_v42, %v722_v43 }
 0x2f3   :  { %v856_v45 = vpop.f32.mrf.mxu0 }
 0x2f4   :  { %729 = vst [vmem:[#allocation16] sm:$0xff] %v723_v44 }
 0x2f5   :  { %v725_v46 = vpop.f32.mrf.mxu0 }
 0x2f6   :  { %v726_v47 = vadd.f32 %v798_v42, %v725_v46 }
 0x2f7   :  { %v857_v48 = vpop.f32.mrf.mxu0 }
 0x2f8   :  { %730 = vst [vmem:[#allocation16 + $0x8] sm:$0xff] %v726_v47 }
 0x2f9   :  { %1111 = shalt.err (!%p1108_p2)
}
 0x2fa   :  { %742 = dma.vmem_to_hbm [thread:$0]  %s737_s23, 256, %s1290_s11, [#allocation4], %s1133_s20, %s1133_s20, %s1134_s21  }
 0x2fb   :  { %1130 = dma.done.wait [#allocation4], 256  }
 0x2fc   :  { %1131 = vsyncadd [#allocation4], 4294967040 }
 0x2fd   :  { %746 = vsyncpa [#allocation3], 1 }
 0x2fe   :  { %747 = vsyncpa [#allocation6], 1 }
 0x2ff   :  { %748 = vsyncpa [#allocation9], 1 }
 0x300   :  { %749 = vsyncpa [#allocation12], 1 }
 0x301   :  { %750 = vsyncpa [#allocation15], 1 }
 0x302   :  { %751 = vsyncpa [#allocation4], 1 }

</bundles_post_ra>
